<compile_context>
chip_gen: v5e
topology: v5e:2x2
jax: 0.10.0
libtpu: 0.0.40
codegen_flags: <defaults>
</compile_context>

<pallas_src>
import functools

import jax
import jax.numpy as jnp
from jax.experimental import pallas as pl
from jax.experimental.pallas import tpu as pltpu

LANE = 128
NEG_INF = -1e30  # fills padded class lanes so exp() underflows to exactly 0


def _round_up(x, m):
    return (x + m - 1) // m * m


def _compiler_params():
    return pltpu.CompilerParams(
        dimension_semantics=("parallel",),          # megacore on v7x; no-op on v5e/v6e
        vmem_limit_bytes=32 * 1024 * 1024,
    )


# ---------------------------------------------------------------------------
# Kernel 1: row-tiled dense matmul  out[i] = x[i] @ w   (bf16 in, f32 acc)
# ---------------------------------------------------------------------------
def _xw_kernel(x_ref, w_ref, out_ref):
    out_ref[...] = jnp.dot(
        x_ref[...], w_ref[...], preferred_element_type=jnp.float32
    ).astype(out_ref.dtype)


def _xw(x_pad, w_pad, tm):
    n_pad, f_pad = x_pad.shape
    d_pad = w_pad.shape[1]
    return pl.pallas_call(
        _xw_kernel,
        out_shape=jax.ShapeDtypeStruct((n_pad, d_pad), jnp.bfloat16),
        grid=(n_pad // tm,),
        in_specs=[
            pl.BlockSpec((tm, f_pad), lambda i: (i, 0)),    # x rows streamed
            pl.BlockSpec((f_pad, d_pad), lambda i: (0, 0)),  # W resident
        ],
        out_specs=pl.BlockSpec((tm, d_pad), lambda i: (i, 0)),
        compiler_params=_compiler_params(),
        cost_estimate=pl.CostEstimate(
            flops=2 * n_pad * f_pad * d_pad,
            transcendentals=0,
            bytes_accessed=2 * (n_pad * f_pad + f_pad * d_pad + n_pad * d_pad),
        ),
    )(x_pad, w_pad)


# ---------------------------------------------------------------------------
# Kernel 2: row-tiled aggregation  out[i] = adj[i, :] @ XW + b
#           (+ optional ReLU, + optional log_softmax over the class lanes)
# ---------------------------------------------------------------------------
def _aggregate_kernel(adj_ref, xw_ref, b_ref, out_ref, *,
                      apply_relu, apply_log_softmax):
    acc = jnp.dot(
        adj_ref[...], xw_ref[...], preferred_element_type=jnp.float32
    ) + b_ref[...]
    if apply_relu:
        acc = jnp.maximum(acc, 0.0)
    if apply_log_softmax:
        # Padded class lanes carry a -1e30 bias -> exp underflows to 0, so the
        # reduction over the full 128-lane vreg equals the true log_softmax.
        m = jnp.max(acc, axis=1, keepdims=True)
        z = acc - m
        lse = jnp.log(jnp.sum(jnp.exp(z), axis=1, keepdims=True))
        acc = z - lse
    out_ref[...] = acc.astype(out_ref.dtype)


def _aggregate(adj_pad, xw_pad, b_pad, tm, *, apply_relu, apply_log_softmax,
               out_dtype):
    n_pad = adj_pad.shape[0]
    d_pad = xw_pad.shape[1]
    kern = functools.partial(
        _aggregate_kernel,
        apply_relu=apply_relu,
        apply_log_softmax=apply_log_softmax,
    )
    return pl.pallas_call(
        kern,
        out_shape=jax.ShapeDtypeStruct((n_pad, d_pad), out_dtype),
        grid=(n_pad // tm,),
        in_specs=[
            pl.BlockSpec((tm, n_pad), lambda i: (i, 0)),     # adj rows streamed
            pl.BlockSpec((n_pad, d_pad), lambda i: (0, 0)),  # XW resident in VMEM
            pl.BlockSpec((1, d_pad), lambda i: (0, 0)),      # bias (lane-dense)
        ],
        out_specs=pl.BlockSpec((tm, d_pad), lambda i: (i, 0)),
        compiler_params=_compiler_params(),
        cost_estimate=pl.CostEstimate(
            flops=2 * n_pad * n_pad * d_pad,
            transcendentals=(n_pad * d_pad) if apply_log_softmax else 0,
            bytes_accessed=2 * n_pad * n_pad + 2 * n_pad * d_pad
            + 4 * n_pad * d_pad,
        ),
    )(adj_pad, xw_pad, b_pad)


# ---------------------------------------------------------------------------
# Full GCNNet forward (eval mode): 2x [aggregate(relu)] then log_softmax(dim=1)
# ---------------------------------------------------------------------------
def gcn_net_forward(x, adj, w1, b1, w2, b2, *, tm=128):
    n, in_c = x.shape
    hid_c = w1.shape[1]
    out_c = w2.shape[1]

    n_pad = _round_up(n, tm)
    in_pad = _round_up(in_c, LANE)
    hid_pad = _round_up(hid_c, LANE)
    out_pad = _round_up(out_c, LANE)

    f32, bf16 = jnp.float32, jnp.bfloat16

    # Zero-padding is exact for features / adjacency / weights / hidden bias.
    x_pad = jnp.zeros((n_pad, in_pad), bf16).at[:n, :in_c].set(x.astype(bf16))
    adj_pad = jnp.zeros((n_pad, n_pad), bf16).at[:n, :n].set(adj.astype(bf16))
    w1_pad = jnp.zeros((in_pad, hid_pad), bf16).at[:in_c, :hid_c].set(w1.astype(bf16))
    b1_pad = jnp.zeros((1, hid_pad), f32).at[:, :hid_c].set(
        b1.reshape(1, hid_c).astype(f32))
    w2_pad = jnp.zeros((hid_pad, out_pad), bf16).at[:hid_c, :out_c].set(w2.astype(bf16))
    # Padded class lanes get -1e30 so they vanish from the in-kernel log_softmax.
    b2_pad = jnp.full((1, out_pad), NEG_INF, f32).at[:, :out_c].set(
        b2.reshape(1, out_c).astype(f32))

    # Layer 1: H = relu(adj @ (X @ W1) + b1)
    xw1 = _xw(x_pad, w1_pad, tm)
    h = _aggregate(adj_pad, xw1, b1_pad, tm,
                   apply_relu=True, apply_log_softmax=False, out_dtype=bf16)
    # dropout(p=0.5) is identity in eval mode.

    # Layer 2 + log_softmax(dim=1): out = log_softmax(adj @ (H @ W2) + b2)
    hw2 = _xw(h, w2_pad, tm)
    out = _aggregate(adj_pad, hw2, b2_pad, tm,
                     apply_relu=False, apply_log_softmax=True, out_dtype=f32)
    return out[:n, :out_c]


def _glorot(key, shape):
    fan_in, fan_out = shape
    limit = (6.0 / (fan_in + fan_out)) ** 0.5
    return jax.random.uniform(key, shape, jnp.float32, -limit, limit)


if __name__ == "__main__":
    # Small synthetic problem: 512 nodes, 16 input feats, 32 hidden, 8 classes.
    # TM=128 -> 4 row blocks, exercising the streamed-adj pipeline.
    N, IN_C, HID_C, OUT_C, TM = 512, 16, 32, 8, 128

    key = jax.random.PRNGKey(0)
    k_x, k_a, k_w1, k_w2 = jax.random.split(key, 4)

    # Node features.
    x = jax.random.normal(k_x, (N, IN_C), jnp.float32)

    # Deterministic random graph -> symmetric adjacency with self loops,
    # symmetrically normalized: D^{-1/2} (A + I) D^{-1/2}.
    a_raw = (jax.random.uniform(k_a, (N, N)) < 0.15).astype(jnp.float32)
    a_sym = jnp.maximum(a_raw, a_raw.T)
    a_hat = a_sym + jnp.eye(N, dtype=jnp.float32)
    deg = jnp.sum(a_hat, axis=1)
    d_inv_sqrt = 1.0 / jnp.sqrt(deg)
    adj = a_hat * d_inv_sqrt[:, None] * d_inv_sqrt[None, :]

    # Deterministic GCN parameters (2 layers, bias=True).
    w1 = _glorot(k_w1, (IN_C, HID_C))
    b1 = jnp.zeros((1, HID_C), jnp.float32)
    w2 = _glorot(k_w2, (HID_C, OUT_C))
    b2 = jnp.zeros((1, OUT_C), jnp.float32)

    out = gcn_net_forward(x, adj, w1, b1, w2, b2, tm=TM)
    jax.block_until_ready(out)

    # Sanity check vs pure-JAX f32 reference (eval mode, dropout = identity).
    # bf16 operands -> loosened tolerance relative to the old all-f32 path.
    h_ref = jnp.maximum(adj @ (x @ w1) + b1, 0.0)
    logits_ref = adj @ (h_ref @ w2) + b2
    ref = jax.nn.log_softmax(logits_ref, axis=1)
    assert out.shape == ref.shape, "shape mismatch vs reference"
    assert jnp.allclose(out, ref, atol=7.5e-2, rtol=7.5e-2), "mismatch vs reference"

    print("KERNEL_OK")
</pallas_src>

<mosaic_0001>
module attributes {stable_mosaic.version = 11 : i64} {
  func.func @_xw_kernel(%arg0: i32, %arg1: memref<128x128xbf16, #tpu.memory_space<vmem>>, %arg2: memref<128x128xbf16, #tpu.memory_space<vmem>>, %arg3: memref<128x128xbf16, #tpu.memory_space<vmem>>) attributes {dimension_semantics = [#tpu.dimension_semantics<parallel>], iteration_bounds = array<i64: 4>, scalar_prefetch = 0 : i64, scratch_operands = 0 : i64, tpu.core_type = #tpu.core_type<tc>, window_params = [{transform_indices = @transform_0, window_bounds = array<i64: 128, 128>}, {pipeline_mode = #tpu.pipeline_mode<synchronous>, transform_indices = @transform_1, window_bounds = array<i64: 128, 128>}, {transform_indices = @transform_2, window_bounds = array<i64: 128, 128>}]} {
    %c0 = arith.constant 0 : index
    %c0_0 = arith.constant 0 : index
    %0 = vector.load %arg1[%c0, %c0_0] : memref<128x128xbf16, #tpu.memory_space<vmem>>, vector<128x128xbf16>
    %c0_1 = arith.constant 0 : index
    %c0_2 = arith.constant 0 : index
    %1 = vector.load %arg2[%c0_1, %c0_2] : memref<128x128xbf16, #tpu.memory_space<vmem>>, vector<128x128xbf16>
    %cst = arith.constant dense<0.000000e+00> : vector<128x128xf32>
    %2 = tpu.matmul %0, %1, %cst {dimension_numbers = #tpu.dot_dimension_numbers<[1], [0], [0], [1], [0, 0, 1, 1], [], []>} : vector<128x128xbf16>, vector<128x128xbf16>, vector<128x128xf32> -> vector<128x128xf32>
    %3 = arith.truncf %2 : vector<128x128xf32> to vector<128x128xbf16>
    %c0_3 = arith.constant 0 : index
    %c0_4 = arith.constant 0 : index
    %4 = vector.load %arg3[%c0_3, %c0_4] : memref<128x128xbf16, #tpu.memory_space<vmem>>, vector<128x128xbf16>
    tpu.vector_store %arg3[%c0_3, %c0_4], %3 {strides = array<i32>} : memref<128x128xbf16, #tpu.memory_space<vmem>>, vector<128x128xbf16>,
    return
  }
  func.func @transform_0(%arg0: i32) -> (i32, i32) {
    %c0_i32 = arith.constant 0 : i32
    %c0_i32_0 = arith.constant 0 : i32
    return %arg0, %c0_i32 : i32, i32
  }
  func.func @transform_1(%arg0: i32) -> (i32, i32) {
    %c0_i32 = arith.constant 0 : i32
    %c0_i32_0 = arith.constant 0 : i32
    %c0_i32_1 = arith.constant 0 : i32
    return %c0_i32, %c0_i32_0 : i32, i32
  }
  func.func @transform_2(%arg0: i32) -> (i32, i32) {
    %c0_i32 = arith.constant 0 : i32
    %c0_i32_0 = arith.constant 0 : i32
    return %arg0, %c0_i32 : i32, i32
  }
}

</mosaic_0001>

<bundles_post_ra>
// kernel: tpu_custom_call.1
= control target key start
LH: loop header
LB: loop body
LE: loop exit
PB: predicated region body
PF: predicated region fallthrough
CT: control target
= control target key end

     0   :  { %7 = vsyncpa [#allocation3], 0  ;;  %s1029_s0 = inlined_call_operand.hbm [shape: bf16[512,128], index: 0, kind: input, shape index: {}]   ;;  %s1030_s1 = inlined_call_operand.hbm [shape: bf16[128,128], index: 1, kind: input, shape index: {}]   ;;  %s1031_s2 = inlined_call_operand.hbm [shape: bf16[512,128], index: 2, kind: output, shape index: {}]  }
   0x1   :  { %9 = vsyncpa [#allocation3 + $0x1], 0 }
   0x2   :  { %10 = vsyncpa [#allocation6], 0 }
   0x3   :  { %11 = vsyncpa [#allocation4], 0 }
   0x4   :  { %13 = vsyncpa [#allocation4 + $0x1], 0  ;;  %s873_s9 = smov 0   ;;  %s875_s10 = smov 0  }
   0x5   :  { %s877_s11 = smov 0   ;;  %s879_s12 = smov 0  }
   0x6 LB: > { %s894_s13 = sadd.s32 4294967295, %s851_s12   ;;  %s491_s14 = sadd.s32 4294967294, %s851_s12   ;;  %s851_s12 = sphi %s879_s12, %s1040_s12   ;;  %s847_s11 = sphi %s877_s11, %s1039_s11   ;;  %s843_s10 = sphi %s875_s10, %s1038_s10   ;;  %s839_s9 = sphi %s873_s9, %s1037_s9  }
   0x7   : > { %p39_p0 = scmp.ne.s32.totalorder %s843_s10, %s839_s9  ;;  %p40_p1 = scmp.eq.s32.totalorder %s894_s13, 0 }
   0x8   : > { %p84_p2 = scmp.eq.s32.totalorder %s894_s13, 3  ;;  %p90_p3 = scmp.eq.s32.totalorder %s491_s14, 3 }
   0x9   : > { %p903_p4 = por %p40_p1, %p39_p0  ;;  %p492_p5 = scmp.ge.s32.totalorder %s851_s12, 1 }
   0xa   : > { %p908_p6 = por %p90_p3, %p39_p0  ;;  %p97_p7 = scmp.lt.s32.totalorder %s851_s12, 5 }
   0xb   : > { %s108_s19 = sshll.u32 %s1030_s1, 4  ;;  %s853_s21 = smov [#allocation5]   ;;  %s109_s19 = int_to_ptr.hbm [resolvable:$true] %s108_s19 }
   0xc   : > { %p916_p8 = pnand %p492_p5, %p97_p7  ;;  %s110_s22 = sshll.u32 %s853_s21, 4  ;;  %s111_s22 = int_to_ptr.vmem [resolvable:$true] %s110_s22 }
   0xd   : > { %s925_s23 = sadd.s32 1, %s851_s12   ;;  %s854_s24 = smov 64  }
   0xe   : > { %p668_p9 = pneg %p916_p8  ;;  %s855_s25 = smov 4  }
   0xf   : > { %s23_s26 = ssub.s32 %s851_s12, %s925_s23  ;;  %s26_s27 = sadd.s32 1, %s847_s11 }
  0x10   : > { %p669_p10 = pnand %p668_p9, %p40_p1  ;;  %p24_p11 = scmp.eq.s32.totalorder %s23_s26, 0 }
  0x11   : > { %p33_p12 = scmp.ne.s32.totalorder %s847_s11, %s843_s10  ;;  %p34_p13 = scmp.eq.s32.totalorder %s851_s12, 0 }
  0x12   : > { %671 = dma.hbm_to_vmem [thread:$0]  (!%p669_p10), %s109_s19, 1024, %s111_s22, [#allocation6], %s854_s24, %s854_s24, %s855_s25  }
  0x13   : > { %s937_s28 = scalar_select %p24_p11, %s847_s11, %s26_s27  }
  0x14   : > { %p941_p0 = por %p84_p2, %p33_p12  ;;  %p681_p3 = scmp.lt.s32.totalorder %s851_s12, 4 }
  0x15   : > { %s124_s30 = sand.u32 1, %s847_s11   ;;  %s571_s3 = sshll.u32 %s851_s12, 6 }
  0x16   : > { %p35_p5 = por %p34_p13, %p33_p12  ;;  %s495_s4 = sshll.u32 %s124_s30, 6 }
  0x17   : > { %s133_s7 = scalar_lea.hbm %s1029_s0, %s571_s3  ;;  %s128_s14 = scalar_lea.vmem [#allocation2], %s495_s4 }
  0x18   : > { %s134_s8 = sshll.u32 %s133_s7, 4  ;;  %s136_s17 = sshll.u32 %s128_s14, 4  ;;  %s135_s8 = int_to_ptr.hbm [resolvable:$true] %s134_s8  ;;  %s137_s17 = int_to_ptr.vmem [resolvable:$true] %s136_s17 }
  0x19   : > { %p951_p7 = pnand %p681_p3, %p35_p5  ;;  %s125_s19 = scalar_lea.sflag [#allocation3], %s124_s30 }
  0x1a   : > { %s751_s21 = sshra.s32 %s135_s8, 4  ;;  %s758_s3 = scalar_lea.hbm %s1029_s0, 256  ;;  %s752_s21 = int_to_ptr.hbm [resolvable:$true] %s751_s21 }
  0x1b   : > { %s753_s22 = scalar_lea.hbm %s752_s21, 64  ;;  %p755_p9 = pneg %p951_p7 }
  0x1c   : > { %p754_p2 = scmp.ne.s32.totalorder %s752_s21, %s753_s22  ;;  %p759_p12 = scmp.lt.s32.totalorder %s752_s21, %s1029_s0 }
  0x1d   : > { %p760_p13 = scmp.lt.s32.totalorder %s758_s3, %s753_s22 }
  0x1e   : > { %p756_p10 = pnand %p755_p9, %p754_p2 }
  0x1f   : > { %p761_p3 = por %p760_p13, %p759_p12 }
  0x20   : > { %p757_p11 = pneg %p756_p10 }
  0x22   : > { %p762_p5 = pnand %p761_p3, %p757_p11 }
  0x24   : > { %765 = shalt.err (!%p762_p5)
}
  0x25   : > { %675 = dma.hbm_to_vmem [thread:$0]  (!%p951_p7), %s135_s8, 1024, %s137_s17, %s125_s19, %s854_s24, %s854_s24, %s855_s25  }
  0x26   : > { %148 = sbr.rel (%p916_p8) target bundleno = 242 (0xf2), region = 28  ;;  %s971_s30 = sand.u32 (!%p916_p8), 1, %s843_s10  }
  0x27   : > { %s499_s6 = sshll.u32 (!%p916_p8), %s971_s30, 6  ;;  %s151_s7 = scalar_lea.sflag (!%p916_p8), [#allocation3], %s971_s30 }
  0x28   : > { %s977_s14 = scalar_lea.vmem (!%p916_p8), [#allocation2], %s499_s6 }
  0x2b   : > { %826 = dma.done.wait (%p903_p4), %s151_s7, 1024  }
  0x2c   : > { %828 = vsyncadd (%p903_p4), %s151_s7, 4294966272 }
  0x2d   : > { %830 = dma.done.wait (%p40_p1), [#allocation6], 1024  }
  0x2e   : > { %832 = vsyncadd (%p40_p1), [#allocation6], 4294966272  ;;  %v587_v0 = vld [vmem:[#allocation5 + $0x38] sm:$0xff]  ;;  %v586_v1 = vld [vmem:[#allocation5 + $0x30] sm:$0xff]  ;;  %s180_s15 = scalar_lea.vmem [#allocation7], %s499_s6  ;;  %s588_s20 = sshll.u32 %s894_s13, 6 }
  0x2f   : > { %311 = vmatpush.bf16.msra.mxu0 %v587_v0  ;;  %636 = vmatpush.bf16.msra.mxu1 %v587_v0  ;;  %v585_v2 = vld [vmem:[#allocation5 + $0x28] sm:$0xff]  ;;  %v584_v3 = vld [vmem:[#allocation5 + $0x20] sm:$0xff]  ;;  %v583_v4 = vld [vmem:[#allocation5 + $0x18] sm:$0xff]  ;;  %s404_s8 = scalar_lea.hbm %s1031_s2, %s588_s20  ;;  %s405_s17 = sshll.u32 %s180_s15, 4  ;;  %s406_s17 = int_to_ptr.vmem [resolvable:$true] %s405_s17 }
  0x30   : > { %637 = vmatpush.bf16.msra.mxu2 %v587_v0  ;;  %638 = vmatpush.bf16.msra.mxu3 %v587_v0  ;;  %v582_v5 = vld [vmem:[#allocation5 + $0x10] sm:$0xff]  ;;  %v581_v6 = vld [vmem:[#allocation5 + $0x8] sm:$0xff]  ;;  %v580_v7 = vld [vmem:[#allocation5] sm:$0xff]  ;;  %s407_s18 = sshll.u32 %s404_s8, 4  ;;  %s393_s13 = scalar_lea.sflag [#allocation4], %s971_s30  ;;  %s408_s18 = int_to_ptr.hbm [resolvable:$true] %s407_s18 }
  0x31   : > { %v572_v8 = vld [vmem:[%s977_s14] sm:$0xff]  ;;  %v574_v9 = vld [vmem:[%s977_s14 + $0x10] sm:$0xff]  ;;  %v573_v12 = vld [vmem:[%s977_s14 + $0x8] sm:$0xff]  ;;  %s795_s19 = sshra.s32 %s408_s18, 4  ;;  %s801_s27 = scalar_lea.hbm %s1031_s2, 256  ;;  %s796_s19 = int_to_ptr.hbm [resolvable:$true] %s795_s19 }
  0x32   : > { %v576_v10 = vld [vmem:[%s977_s14 + $0x20] sm:$0xff]  ;;  %v578_v11 = vld [vmem:[%s977_s14 + $0x30] sm:$0xff]  ;;  %v575_v13 = vld [vmem:[%s977_s14 + $0x18] sm:$0xff]  ;;  %s797_s21 = scalar_lea.hbm %s796_s19, 64  ;;  %p802_p7 = scmp.lt.s32.totalorder %s796_s19, %s1031_s2 }
  0x33   : > { %312 = vmatpush.bf16.msra.mxu0 %v586_v1  ;;  %639 = vmatpush.bf16.msra.mxu1 %v586_v1  ;;  %v577_v14 = vld [vmem:[%s977_s14 + $0x28] sm:$0xff]  ;;  %v579_v15 = vld [vmem:[%s977_s14 + $0x38] sm:$0xff]  ;;  %p798_p1 = scmp.ne.s32.totalorder %s796_s19, %s797_s21  ;;  %p803_p2 = scmp.lt.s32.totalorder %s801_s27, %s797_s21 }
  0x34   : > { %640 = vmatpush.bf16.msra.mxu2 %v586_v1  ;;  %641 = vmatpush.bf16.msra.mxu3 %v586_v1 }
  0x35   : > { %p799_p4 = pnand %p798_p1, %p941_p0  ;;  %p804_p9 = por %p803_p2, %p802_p7 }
  0x37   : > { %313 = vmatpush.bf16.msra.mxu0 %v585_v2  ;;  %642 = vmatpush.bf16.msra.mxu1 %v585_v2  ;;  %p800_p8 = pneg %p799_p4 }
  0x38   : > { %643 = vmatpush.bf16.msra.mxu2 %v585_v2  ;;  %644 = vmatpush.bf16.msra.mxu3 %v585_v2 }
  0x39   : > { %p805_p10 = pnand %p804_p9, %p800_p8 }
  0x3b   : > { %314 = vmatpush.bf16.msra.mxu0 %v584_v3  ;;  %645 = vmatpush.bf16.msra.mxu1 %v584_v3 }
  0x3c   : > { %646 = vmatpush.bf16.msra.mxu2 %v584_v3  ;;  %647 = vmatpush.bf16.msra.mxu3 %v584_v3 }
  0x3f   : > { %315 = vmatpush.bf16.msra.mxu0 %v583_v4  ;;  %648 = vmatpush.bf16.msra.mxu1 %v583_v4 }
  0x40   : > { %649 = vmatpush.bf16.msra.mxu2 %v583_v4  ;;  %650 = vmatpush.bf16.msra.mxu3 %v583_v4 }
  0x43   : > { %316 = vmatpush.bf16.msra.mxu0 %v582_v5  ;;  %651 = vmatpush.bf16.msra.mxu1 %v582_v5 }
  0x44   : > { %652 = vmatpush.bf16.msra.mxu2 %v582_v5  ;;  %653 = vmatpush.bf16.msra.mxu3 %v582_v5 }
  0x47   : > { %317 = vmatpush.bf16.msra.mxu0 %v581_v6  ;;  %654 = vmatpush.bf16.msra.mxu1 %v581_v6 }
  0x48   : > { %655 = vmatpush.bf16.msra.mxu2 %v581_v6  ;;  %656 = vmatpush.bf16.msra.mxu3 %v581_v6 }
  0x4b   : > { %318 = vmatpush.bf16.msra.mxu0 %v580_v7  ;;  %657 = vmatpush.bf16.msra.mxu1 %v580_v7 }
  0x4c   : > { %658 = vmatpush.bf16.msra.mxu2 %v580_v7  ;;  %659 = vmatpush.bf16.msra.mxu3 %v580_v7 }
  0x4e   : > { %319 = vmatmul.bf16.vlgmr.msra.gmra.mxu0 %v572_v8  ;;  %329 = vmatmul.bf16.vlgmr.msra.gmra.mxu1 %v574_v9 }
  0x4f   : > { %339 = vmatmul.bf16.vlgmr.msra.gmra.mxu2 %v576_v10  ;;  %349 = vmatmul.bf16.vlgmr.msra.gmra.mxu3 %v578_v11 }
  0x5e   : > { %324 = vmatmul.bf16.gmra.mxu0 %v573_v12  ;;  %334 = vmatmul.bf16.gmra.mxu1 %v575_v13 }
  0x5f   : > { %344 = vmatmul.bf16.gmra.mxu2 %v577_v14  ;;  %354 = vmatmul.bf16.gmra.mxu3 %v579_v15 }
  0xcb   : > { %v320_v16 = vpop.f32.mrf.mxu0  ;;  %v330_v17 = vpop.f32.mrf.mxu1 }
  0xd2   : > { %v340_v18 = vpop.f32.mrf.mxu2  ;;  %v350_v19 = vpop.f32.mrf.mxu3 }
  0xd3   : > { %v322_v20 = vpop.f32.mrf.mxu0  ;;  %v332_v21 = vpop.f32.mrf.mxu1 }
  0xd4   : > { %v592_v22 = vpack.c.bf16 %v322_v20, %v320_v16  ;;  %v602_v23 = vpack.c.bf16 %v332_v21, %v330_v17 }
  0xd6   : > { %593 = vst [vmem:[%s180_s15] sm:$0xff] %v592_v22  }
  0xd7   : > { %630 = vst [vmem:[%s180_s15 + $0x10] sm:$0xff] %v602_v23  }
  0xda   : > { %v342_v24 = vpop.f32.mrf.mxu2  ;;  %v352_v25 = vpop.f32.mrf.mxu3 }
  0xdb   : > { %v612_v26 = vpack.c.bf16 %v342_v24, %v340_v18  ;;  %v622_v27 = vpack.c.bf16 %v352_v25, %v350_v19  ;;  %v325_v28 = vpop.f32.mrf.mxu0  ;;  %v335_v29 = vpop.f32.mrf.mxu1 }
  0xdd   : > { %632 = vst [vmem:[%s180_s15 + $0x20] sm:$0xff] %v612_v26  }
  0xde   : > { %634 = vst [vmem:[%s180_s15 + $0x30] sm:$0xff] %v622_v27  }
  0xe2   : > { %v345_v30 = vpop.f32.mrf.mxu2  ;;  %v355_v31 = vpop.f32.mrf.mxu3 }
  0xe3   : > { %v327_v32 = vpop.f32.mrf.mxu0  ;;  %v337_v33 = vpop.f32.mrf.mxu1 }
  0xe4   : > { %v597_v34 = vpack.c.bf16 %v327_v32, %v325_v28  ;;  %v607_v35 = vpack.c.bf16 %v337_v33, %v335_v29 }
  0xe6   : > { %629 = vst [vmem:[%s180_s15 + $0x8] sm:$0xff] %v597_v34  }
  0xe7   : > { %631 = vst [vmem:[%s180_s15 + $0x18] sm:$0xff] %v607_v35  }
  0xea   : > { %v347_v36 = vpop.f32.mrf.mxu2  ;;  %v357_v37 = vpop.f32.mrf.mxu3 }
  0xeb   : > { %v617_v38 = vpack.c.bf16 %v347_v36, %v345_v30  ;;  %v627_v39 = vpack.c.bf16 %v357_v37, %v355_v31 }
  0xed   : > { %633 = vst [vmem:[%s180_s15 + $0x28] sm:$0xff] %v617_v38  }
  0xee   : > { %635 = vst [vmem:[%s180_s15 + $0x38] sm:$0xff] %v627_v39  }
  0xef   : > { %808 = shalt.err (!%p805_p10)
}
  0xf0   : > { %s856_s5 = smov 64   ;;  %s857_s30 = smov 4  }
  0xf1   : > { %666 = dma.vmem_to_hbm [thread:$0]  (%p941_p0), %s406_s17, 1024, %s408_s18, %s393_s13, %s856_s5, %s856_s5, %s857_s30  }
  0xf2 PF: > { %p683_p11 = scmp.ge.s32.totalorder %s851_s12, 2  ;;  %s422_s6 = sand.u32 1, %s839_s9  }
  0xf3   : > { %s423_s7 = scalar_lea.sflag [#allocation4], %s422_s6 }
  0xf4   : > { %p677_p12 = pnand %p683_p11, %p908_p6 }
  0xf6   : > { %p678_p13 = pneg %p677_p12 }
  0xf8   : > { %834 = dma.done.wait (%p678_p13), %s423_s7, 1024  }
  0xf9   : > { %836 = vsyncadd (%p678_p13), %s423_s7, 4294966272  ;;  %p16_p3 = scmp.ge.s32.totalorder %s925_s23, 6   ;;  %s1037_s9 = smov %s843_s10 }
  0xfa   : > { %s1038_s10 = smov %s847_s11  ;;  %s1039_s11 = smov %s937_s28 }
  0xfb   : > { %s1040_s12 = smov %s925_s23  ;;  %18 = sbr.rel (!%p16_p3) target bundleno = 6 (0x6), region = 77 }
 0x100   :  { %429 = vsyncpa [#allocation3], 1 }
 0x101   :  { %431 = vsyncpa [#allocation3 + $0x1], 1 }
 0x102   :  { %432 = vsyncpa [#allocation6], 1 }
 0x103   :  { %433 = vsyncpa [#allocation4], 1 }
 0x104   :  { %435 = vsyncpa [#allocation4 + $0x1], 1 }

</bundles_post_ra>
